<compile_context>
chip_gen: v7x
topology: tpu7x:2x2x1
jax: 0.10.0
libtpu: 0.0.40
codegen_flags: <defaults>
</compile_context>

<pallas_src>
import functools

import jax
import jax.numpy as jnp
from jax.experimental import pallas as pl
from jax.experimental.pallas import tpu as pltpu

LANE = 128                       # lane width: channel dims padded to this
VMEM_LIMIT = 32 * 1024 * 1024    # scoped-VMEM budget that is safe on v5e/v6e/v7x


# ------------------------------ small helpers -------------------------------

def _round_up(x, m):
    return (x + m - 1) // m * m


def _pick_tile(dim, candidates):
    for t in candidates:
        if dim % t == 0:
            return t
    return dim


def _pad_to(a, shape):
    pads = [(0, t - s) for s, t in zip(a.shape, shape)]
    if all(p == (0, 0) for p in pads):
        return a
    return jnp.pad(a, pads)


def _cost(flops, bytes_accessed):
    return pl.CostEstimate(flops=int(flops), transcendentals=0,
                           bytes_accessed=int(bytes_accessed))


# ------------------------------ Pallas kernels ------------------------------

def _mm_affine_kernel(x_ref, w_ref, scale_ref, bias_ref, o_ref, acc_ref, *, relu):
    """Tiled (TM,TK)x(TK,TN) matmul, K accumulated in f32 scratch, affine+ReLU."""
    @pl.when(pl.program_id(2) == 0)
    def _():
        acc_ref[...] = jnp.zeros_like(acc_ref)

    acc_ref[...] += jnp.dot(x_ref[...], w_ref[...],
                            preferred_element_type=jnp.float32)

    @pl.when(pl.program_id(2) == pl.num_programs(2) - 1)
    def _():
        y = acc_ref[...] * scale_ref[...] + bias_ref[...]
        if relu:
            y = jnp.maximum(y, 0.0)
        o_ref[...] = y.astype(o_ref.dtype)


def _mm_affine_add_proj_kernel(x_ref, w3_ref, s3_ref, b3_ref,
                               xs_ref, ws_ref, ss_ref, bs_ref, o_ref):
    """conv3(1x1)+bn3 fused with projection shortcut conv(1x1)+bn, add, ReLU."""
    y = jnp.dot(x_ref[...], w3_ref[...], preferred_element_type=jnp.float32)
    y = y * s3_ref[...] + b3_ref[...]
    sc = jnp.dot(xs_ref[...], ws_ref[...], preferred_element_type=jnp.float32)
    sc = sc * ss_ref[...] + bs_ref[...]
    o_ref[...] = jnp.maximum(y + sc, 0.0).astype(o_ref.dtype)


def _mm_affine_add_ident_kernel(x_ref, w3_ref, s3_ref, b3_ref, sc_ref, o_ref):
    """conv3(1x1)+bn3 fused with identity shortcut add and final ReLU."""
    y = jnp.dot(x_ref[...], w3_ref[...], preferred_element_type=jnp.float32)
    y = y * s3_ref[...] + b3_ref[...] + sc_ref[...].astype(jnp.float32)
    o_ref[...] = jnp.maximum(y, 0.0).astype(o_ref.dtype)


def _conv3x3_bn_relu_kernel(x_ref, w_ref, scale_ref, bias_ref, o_ref,
                            xpad_ref, *, stride):
    """3x3 conv (pad=1, stride) + bn + ReLU for one image x one Cout tile.

    The halo is built in a VMEM scratch (no HBM jnp.pad pass); the scratch is
    filled once per image (co == 0) and reused across all Cout tiles.
    """
    co = pl.program_id(1)
    H, W, Cin = x_ref.shape
    Ho, Wo, Cout = o_ref.shape

    @pl.when(co == 0)
    def _():
        xpad_ref[...] = jnp.zeros_like(xpad_ref)
        xpad_ref[1:H + 1, 1:W + 1, :] = x_ref[...].astype(xpad_ref.dtype)

    acc = jnp.zeros((Ho * Wo, Cout), jnp.float32)
    for kh in range(3):
        for kw in range(3):
            if stride == 1:
                patch = xpad_ref[kh:kh + Ho, kw:kw + Wo, :]
            else:
                patch = xpad_ref[pl.ds(kh, Ho, stride=stride),
                                 pl.ds(kw, Wo, stride=stride), :]
            acc = acc + jnp.dot(
                patch.astype(jnp.bfloat16).reshape(Ho * Wo, Cin),
                w_ref[kh * 3 + kw],
                preferred_element_type=jnp.float32)

    y = jnp.maximum(acc * scale_ref[...] + bias_ref[...], 0.0)
    o_ref[...] = y.reshape(Ho, Wo, Cout).astype(o_ref.dtype)


# ------------------------------ kernel wrappers ------------------------------

def conv1x1_bn_act(x2d, w, scale, bias, *, relu, out_dtype):
    M, K = x2d.shape
    Nc = w.shape[1]
    TM = _pick_tile(M, (512, 256, 128, 64, 32, 16, 8))
    TN = _pick_tile(Nc, (256, 128))
    TK = _pick_tile(K, (512, 256, 128))
    grid = (M // TM, Nc // TN, K // TK)
    return pl.pallas_call(
        functools.partial(_mm_affine_kernel, relu=relu),
        out_shape=jax.ShapeDtypeStruct((M, Nc), out_dtype),
        grid_spec=pltpu.PrefetchScalarGridSpec(
            num_scalar_prefetch=0,
            grid=grid,
            in_specs=[
                pl.BlockSpec((TM, TK), lambda i, j, k: (i, k)),
                pl.BlockSpec((TK, TN), lambda i, j, k: (k, j)),
                pl.BlockSpec((1, TN), lambda i, j, k: (0, j)),
                pl.BlockSpec((1, TN), lambda i, j, k: (0, j)),
            ],
            out_specs=pl.BlockSpec((TM, TN), lambda i, j, k: (i, j)),
            scratch_shapes=[pltpu.VMEM((TM, TN), jnp.float32)],
        ),
        compiler_params=pltpu.CompilerParams(
            dimension_semantics=("parallel", "parallel", "arbitrary"),
            vmem_limit_bytes=VMEM_LIMIT),
        cost_estimate=_cost(2 * M * K * Nc, 2 * (M * K + K * Nc + M * Nc)),
    )(x2d, w, scale, bias)


def conv3x3_bn_relu(x4d, w9, scale, bias, *, stride, Ho, Wo):
    N, H, W, Cin = x4d.shape
    Cout = w9.shape[-1]
    TN = _pick_tile(Cout, (256, 128))
    grid = (N, Cout // TN)
    return pl.pallas_call(
        functools.partial(_conv3x3_bn_relu_kernel, stride=stride),
        out_shape=jax.ShapeDtypeStruct((N, Ho, Wo, Cout), jnp.bfloat16),
        grid_spec=pltpu.PrefetchScalarGridSpec(
            num_scalar_prefetch=0,
            grid=grid,
            in_specs=[
                pl.BlockSpec((None, H, W, Cin), lambda n, c: (n, 0, 0, 0)),
                pl.BlockSpec((9, Cin, TN), lambda n, c: (0, 0, c)),
                pl.BlockSpec((1, TN), lambda n, c: (0, c)),
                pl.BlockSpec((1, TN), lambda n, c: (0, c)),
            ],
            out_specs=pl.BlockSpec((None, Ho, Wo, TN), lambda n, c: (n, 0, 0, c)),
            scratch_shapes=[pltpu.VMEM((H + 2, W + 2, Cin), jnp.float32)],
        ),
        compiler_params=pltpu.CompilerParams(
            dimension_semantics=("parallel", "arbitrary"),
            vmem_limit_bytes=VMEM_LIMIT),
        cost_estimate=_cost(
            2 * 9 * N * Ho * Wo * Cin * Cout,
            2 * (N * H * W * Cin + 9 * Cin * Cout + N * Ho * Wo * Cout)),
    )(x4d, w9, scale, bias)


def conv1x1_bn_add_proj(x2d, w3, s3, b3, xs2d, ws, ss, bs):
    M, K3 = x2d.shape
    Ks = xs2d.shape[1]
    Nc = w3.shape[1]
    TM = _pick_tile(M, (512, 256, 128, 64, 32, 16, 8))
    TN = _pick_tile(Nc, (256, 128))
    grid = (M // TM, Nc // TN)
    return pl.pallas_call(
        _mm_affine_add_proj_kernel,
        out_shape=jax.ShapeDtypeStruct((M, Nc), jnp.float32),
        grid_spec=pltpu.PrefetchScalarGridSpec(
            num_scalar_prefetch=0,
            grid=grid,
            in_specs=[
                pl.BlockSpec((TM, K3), lambda i, j: (i, 0)),
                pl.BlockSpec((K3, TN), lambda i, j: (0, j)),
                pl.BlockSpec((1, TN), lambda i, j: (0, j)),
                pl.BlockSpec((1, TN), lambda i, j: (0, j)),
                pl.BlockSpec((TM, Ks), lambda i, j: (i, 0)),
                pl.BlockSpec((Ks, TN), lambda i, j: (0, j)),
                pl.BlockSpec((1, TN), lambda i, j: (0, j)),
                pl.BlockSpec((1, TN), lambda i, j: (0, j)),
            ],
            out_specs=pl.BlockSpec((TM, TN), lambda i, j: (i, j)),
        ),
        compiler_params=pltpu.CompilerParams(
            dimension_semantics=("parallel", "parallel"),
            vmem_limit_bytes=VMEM_LIMIT),
        cost_estimate=_cost(
            2 * M * (K3 + Ks) * Nc,
            2 * (M * (K3 + Ks) + (K3 + Ks) * Nc) + 4 * M * Nc),
    )(x2d, w3, s3, b3, xs2d, ws, ss, bs)


def conv1x1_bn_add_identity(x2d, w3, s3, b3, sc2d):
    M, K3 = x2d.shape
    Nc = w3.shape[1]
    TM = _pick_tile(M, (512, 256, 128, 64, 32, 16, 8))
    TN = _pick_tile(Nc, (256, 128))
    grid = (M // TM, Nc // TN)
    return pl.pallas_call(
        _mm_affine_add_ident_kernel,
        out_shape=jax.ShapeDtypeStruct((M, Nc), jnp.float32),
        grid_spec=pltpu.PrefetchScalarGridSpec(
            num_scalar_prefetch=0,
            grid=grid,
            in_specs=[
                pl.BlockSpec((TM, K3), lambda i, j: (i, 0)),
                pl.BlockSpec((K3, TN), lambda i, j: (0, j)),
                pl.BlockSpec((1, TN), lambda i, j: (0, j)),
                pl.BlockSpec((1, TN), lambda i, j: (0, j)),
                pl.BlockSpec((TM, TN), lambda i, j: (i, j)),
            ],
            out_specs=pl.BlockSpec((TM, TN), lambda i, j: (i, j)),
        ),
        compiler_params=pltpu.CompilerParams(
            dimension_semantics=("parallel", "parallel"),
            vmem_limit_bytes=VMEM_LIMIT),
        cost_estimate=_cost(2 * M * K3 * Nc,
                            2 * (M * K3 + K3 * Nc + M * Nc) + 4 * M * Nc),
    )(x2d, w3, s3, b3, sc2d)


# --------------------------- Bottleneck forward ------------------------------

def bottleneck_forward(x_nchw, padded, stride=1):
    """Matches Bottleneck.forward of the PyTorch module (inference-folded BN)."""
    cin, p, cexp, cinp, pp, cexpp = padded["dims"]
    N, Cin, H, W = x_nchw.shape
    assert Cin == cin
    x = jnp.transpose(x_nchw, (0, 2, 3, 1))                     # -> NHWC
    xb = _pad_to(x, (N, H, W, cinp)).astype(jnp.bfloat16)       # lane-pad + bf16

    # conv1 (1x1) + bn1 + relu
    M1 = N * H * W
    out1 = conv1x1_bn_act(
        xb.reshape(M1, cinp), padded["w1"], padded["s1"], padded["b1"],
        relu=True, out_dtype=jnp.bfloat16)                      # (M1, pp) bf16

    # conv2 (3x3, stride, pad=1) + bn2 + relu  (halo built in VMEM scratch)
    Ho = (H + 2 - 3) // stride + 1
    Wo = (W + 2 - 3) // stride + 1
    out2 = conv3x3_bn_relu(
        out1.reshape(N, H, W, pp), padded["w2"], padded["s2"], padded["b2"],
        stride=stride, Ho=Ho, Wo=Wo)                            # (N,Ho,Wo,pp) bf16

    # conv3 (1x1) + bn3 + shortcut + add + relu, fused in one kernel
    M3 = N * Ho * Wo
    if stride != 1 or cin != cexp:
        if stride != 1:
            # TODO(synk): fold the stride-2 shortcut subsampling into the conv3
            # input BlockSpec (strided DMA) instead of this XLA strided slice.
            xs = xb[:, ::stride, ::stride, :]
        else:
            xs = xb
        out3 = conv1x1_bn_add_proj(
            out2.reshape(M3, pp), padded["w3"], padded["s3"], padded["b3"],
            xs.reshape(M3, cinp), padded["ws"], padded["ss"], padded["bs"])
    else:
        out3 = conv1x1_bn_add_identity(
            out2.reshape(M3, pp), padded["w3"], padded["s3"], padded["b3"],
            xb.reshape(M3, cexpp))

    out3 = out3.reshape(N, Ho, Wo, cexpp)[..., :cexp]
    return jnp.transpose(out3, (0, 3, 1, 2))                    # -> NCHW


# ----------------------- parameters (deterministic) ---------------------------

def _fold_bn(gamma, beta, mean, var, eps=1e-5):
    scale = gamma / jnp.sqrt(var + eps)
    bias = beta - mean * scale
    return scale, bias


def init_params(key, in_planes, planes, expansion=4):
    cexp = expansion * planes
    keys = jax.random.split(key, 16)

    def bn_params(k, c):
        k1, k2, k3, k4 = jax.random.split(k, 4)
        gamma = jax.random.uniform(k1, (c,), jnp.float32, 0.5, 1.5)
        beta = 0.1 * jax.random.normal(k2, (c,), jnp.float32)
        mean = 0.1 * jax.random.normal(k3, (c,), jnp.float32)
        var = jax.random.uniform(k4, (c,), jnp.float32, 0.5, 1.5)
        return _fold_bn(gamma, beta, mean, var)

    p = {}
    p["w1"] = 0.1 * jax.random.normal(keys[0], (in_planes, planes), jnp.float32)
    p["s1"], p["b1"] = bn_params(keys[1], planes)
    p["w2"] = 0.1 * jax.random.normal(keys[2], (3, 3, planes, planes), jnp.float32)
    p["s2"], p["b2"] = bn_params(keys[3], planes)
    p["w3"] = 0.1 * jax.random.normal(keys[4], (planes, cexp), jnp.float32)
    p["s3"], p["b3"] = bn_params(keys[5], cexp)
    p["ws"] = 0.1 * jax.random.normal(keys[6], (in_planes, cexp), jnp.float32)
    p["ss"], p["bs"] = bn_params(keys[7], cexp)
    return p


def prepare_params(params):
    """Lane-pad channel dims to multiples of 128 and cast weights to bf16."""
    cin, p = params["w1"].shape
    cexp = params["w3"].shape[1]
    cinp, pp, cexpp = (_round_up(c, LANE) for c in (cin, p, cexp))

    def pad_w(w, r, c):
        return _pad_to(w, (r, c)).astype(jnp.bfloat16)

    def pad_v(v, c):
        return _pad_to(v, (c,)).astype(jnp.float32).reshape(1, c)

    q = {"dims": (cin, p, cexp, cinp, pp, cexpp)}
    q["w1"] = pad_w(params["w1"], cinp, pp)
    q["s1"], q["b1"] = pad_v(params["s1"], pp), pad_v(params["b1"], pp)
    q["w2"] = _pad_to(params["w2"].reshape(9, p, p), (9, pp, pp)).astype(jnp.bfloat16)
    q["s2"], q["b2"] = pad_v(params["s2"], pp), pad_v(params["b2"], pp)
    q["w3"] = pad_w(params["w3"], pp, cexpp)
    q["s3"], q["b3"] = pad_v(params["s3"], cexpp), pad_v(params["b3"], cexpp)
    q["ws"] = pad_w(params["ws"], cinp, cexpp)
    q["ss"], q["bs"] = pad_v(params["ss"], cexpp), pad_v(params["bs"], cexpp)
    return q


# --------------------------- pure-JAX reference -------------------------------

def bottleneck_reference(x_nchw, params, stride):
    """XLA reference with the same bf16-input / f32-accumulate numerics."""
    x = jnp.transpose(x_nchw, (0, 2, 3, 1)).astype(jnp.float32)
    b16 = lambda a: a.astype(jnp.bfloat16)

    def conv1x1(v, w):
        return jax.lax.dot_general(
            b16(v), b16(w), (((v.ndim - 1,), (0,)), ((), ())),
            preferred_element_type=jnp.float32)

    out = jnp.maximum(conv1x1(x, params["w1"]) * params["s1"] + params["b1"], 0.0)
    out = jax.lax.conv_general_dilated(
        b16(out), b16(params["w2"]), (stride, stride), ((1, 1), (1, 1)),
        dimension_numbers=("NHWC", "HWIO", "NHWC"),
        preferred_element_type=jnp.float32)
    out = jnp.maximum(out * params["s2"] + params["b2"], 0.0)
    out = conv1x1(out, params["w3"]) * params["s3"] + params["b3"]

    cin, cexp = params["w1"].shape[0], params["w3"].shape[1]
    if stride != 1 or cin != cexp:
        xs = x[:, ::stride, ::stride, :]
        sc = conv1x1(xs, params["ws"]) * params["ss"] + params["bs"]
    else:
        sc = b16(x).astype(jnp.float32)
    out = jnp.maximum(out + sc, 0.0)
    return jnp.transpose(out, (0, 3, 1, 2))


# ----------------------------------- main -------------------------------------

if __name__ == "__main__":
    key = jax.random.PRNGKey(0)
    k_x1, k_p1, k_x2, k_p2 = jax.random.split(key, 4)

    # Config 1: projection shortcut (in_planes != expansion*planes), stride=1.
    N, in_planes, planes, H, W = 2, 16, 8, 8, 8
    x1 = jax.random.normal(k_x1, (N, in_planes, H, W), jnp.float32)
    params1 = init_params(k_p1, in_planes, planes)
    padded1 = prepare_params(params1)
    out1 = jax.block_until_ready(bottleneck_forward(x1, padded1, stride=1))
    ref1 = jax.block_until_ready(bottleneck_reference(x1, params1, 1))
    assert out1.shape == (N, 4 * planes, H, W)
    assert bool(jnp.all(out1 >= 0.0))                       # final ReLU
    err1 = float(jnp.max(jnp.abs(out1 - ref1)))
    assert err1 < 5e-2, f"projection-path mismatch: {err1}"

    # Config 2: identity shortcut (in_planes == expansion*planes), stride=1.
    in_planes2 = 4 * planes
    x2 = jax.random.normal(k_x2, (N, in_planes2, H, W), jnp.float32)
    params2 = init_params(k_p2, in_planes2, planes)
    padded2 = prepare_params(params2)
    out2 = jax.block_until_ready(bottleneck_forward(x2, padded2, stride=1))
    ref2 = jax.block_until_ready(bottleneck_reference(x2, params2, 1))
    assert out2.shape == (N, 4 * planes, H, W)
    assert bool(jnp.all(out2 >= 0.0))
    err2 = float(jnp.max(jnp.abs(out2 - ref2)))
    assert err2 < 5e-2, f"identity-path mismatch: {err2}"

    print("KERNEL_OK")
</pallas_src>

<mosaic_0001>
module attributes {stable_mosaic.version = 11 : i64} {
  func.func @_mm_affine_kernel(%arg0: i32, %arg1: i32, %arg2: i32, %arg3: memref<128x128xbf16, #tpu.memory_space<vmem>>, %arg4: memref<128x128xbf16, #tpu.memory_space<vmem>>, %arg5: memref<1x128xf32, #tpu.memory_space<vmem>>, %arg6: memref<1x128xf32, #tpu.memory_space<vmem>>, %arg7: memref<128x128xbf16, #tpu.memory_space<vmem>>, %arg8: memref<128x128xf32, #tpu.memory_space<vmem>>) attributes {dimension_semantics = [#tpu.dimension_semantics<parallel>, #tpu.dimension_semantics<parallel>, #tpu.dimension_semantics<arbitrary>], iteration_bounds = array<i64: 1, 1, 1>, scalar_prefetch = 0 : i64, scratch_operands = 1 : i64, tpu.core_type = #tpu.core_type<tc>, window_params = [{transform_indices = @transform_0, window_bounds = array<i64: 128, 128>}, {transform_indices = @transform_1, window_bounds = array<i64: 128, 128>}, {transform_indices = @transform_2, window_bounds = array<i64: 1, 128>}, {transform_indices = @transform_3, window_bounds = array<i64: 1, 128>}, {transform_indices = @transform_4, window_bounds = array<i64: 128, 128>}]} {
    %c0_i32 = arith.constant 0 : i32
    %0 = arith.cmpi eq, %arg2, %c0_i32 : i32
    %1 = arith.extui %0 : i1 to i32
    %c0_i32_0 = arith.constant 0 : i32
    %2 = arith.cmpi ne, %1, %c0_i32_0 : i32
    scf.if %2 {
      %cst_10 = arith.constant 0.000000e+00 : f32
      %12 = vector.broadcast %cst_10 : f32 to vector<128x128xf32>
      %c0_11 = arith.constant 0 : index
      %c0_12 = arith.constant 0 : index
      %13 = vector.load %arg8[%c0_11, %c0_12] : memref<128x128xf32, #tpu.memory_space<vmem>>, vector<128x128xf32>
      tpu.vector_store %arg8[%c0_11, %c0_12], %12 {strides = array<i32>} : memref<128x128xf32, #tpu.memory_space<vmem>>, vector<128x128xf32>,
    } else {
    }
    %c0 = arith.constant 0 : index
    %c0_1 = arith.constant 0 : index
    %3 = vector.load %arg8[%c0, %c0_1] : memref<128x128xf32, #tpu.memory_space<vmem>>, vector<128x128xf32>
    %c0_2 = arith.constant 0 : index
    %c0_3 = arith.constant 0 : index
    %4 = vector.load %arg3[%c0_2, %c0_3] : memref<128x128xbf16, #tpu.memory_space<vmem>>, vector<128x128xbf16>
    %c0_4 = arith.constant 0 : index
    %c0_5 = arith.constant 0 : index
    %5 = vector.load %arg4[%c0_4, %c0_5] : memref<128x128xbf16, #tpu.memory_space<vmem>>, vector<128x128xbf16>
    %cst = arith.constant dense<0.000000e+00> : vector<128x128xf32>
    %6 = tpu.matmul %4, %5, %cst {dimension_numbers = #tpu.dot_dimension_numbers<[1], [0], [0], [1], [0, 0, 1, 1], [], []>} : vector<128x128xbf16>, vector<128x128xbf16>, vector<128x128xf32> -> vector<128x128xf32>
    %7 = arith.addf %3, %6 : vector<128x128xf32>
    %c0_6 = arith.constant 0 : index
    %c0_7 = arith.constant 0 : index
    %8 = vector.load %arg8[%c0_6, %c0_7] : memref<128x128xf32, #tpu.memory_space<vmem>>, vector<128x128xf32>
    tpu.vector_store %arg8[%c0_6, %c0_7], %7 {strides = array<i32>} : memref<128x128xf32, #tpu.memory_space<vmem>>, vector<128x128xf32>,
    %c0_i32_8 = arith.constant 0 : i32
    %9 = arith.cmpi eq, %arg2, %c0_i32_8 : i32
    %10 = arith.extui %9 : i1 to i32
    %c0_i32_9 = arith.constant 0 : i32
    %11 = arith.cmpi ne, %10, %c0_i32_9 : i32
    scf.if %11 {
      %c0_10 = arith.constant 0 : index
      %c0_11 = arith.constant 0 : index
      %12 = vector.load %arg8[%c0_10, %c0_11] : memref<128x128xf32, #tpu.memory_space<vmem>>, vector<128x128xf32>
      %c0_12 = arith.constant 0 : index
      %c0_13 = arith.constant 0 : index
      %13 = vector.load %arg5[%c0_12, %c0_13] : memref<1x128xf32, #tpu.memory_space<vmem>>, vector<1x128xf32>
      %14 = vector.broadcast %13 : vector<1x128xf32> to vector<128x128xf32>
      %15 = arith.mulf %12, %14 : vector<128x128xf32>
      %c0_14 = arith.constant 0 : index
      %c0_15 = arith.constant 0 : index
      %16 = vector.load %arg6[%c0_14, %c0_15] : memref<1x128xf32, #tpu.memory_space<vmem>>, vector<1x128xf32>
      %17 = vector.broadcast %16 : vector<1x128xf32> to vector<128x128xf32>
      %18 = arith.addf %15, %17 : vector<128x128xf32>
      %cst_16 = arith.constant 0.000000e+00 : f32
      %19 = vector.broadcast %cst_16 : f32 to vector<128x128xf32>
      %20 = arith.maximumf %18, %19 : vector<128x128xf32>
      %21 = arith.truncf %20 : vector<128x128xf32> to vector<128x128xbf16>
      %c0_17 = arith.constant 0 : index
      %c0_18 = arith.constant 0 : index
      %22 = vector.load %arg7[%c0_17, %c0_18] : memref<128x128xbf16, #tpu.memory_space<vmem>>, vector<128x128xbf16>
      tpu.vector_store %arg7[%c0_17, %c0_18], %21 {strides = array<i32>} : memref<128x128xbf16, #tpu.memory_space<vmem>>, vector<128x128xbf16>,
    } else {
    }
    return
  }
  func.func @transform_0(%arg0: i32, %arg1: i32, %arg2: i32) -> (i32, i32) {
    %c0_i32 = arith.constant 0 : i32
    return %arg0, %arg2 : i32, i32
  }
  func.func @transform_1(%arg0: i32, %arg1: i32, %arg2: i32) -> (i32, i32) {
    %c0_i32 = arith.constant 0 : i32
    return %arg2, %arg1 : i32, i32
  }
  func.func @transform_2(%arg0: i32, %arg1: i32, %arg2: i32) -> (i32, i32) {
    %c0_i32 = arith.constant 0 : i32
    %c0_i32_0 = arith.constant 0 : i32
    return %c0_i32, %arg1 : i32, i32
  }
  func.func @transform_3(%arg0: i32, %arg1: i32, %arg2: i32) -> (i32, i32) {
    %c0_i32 = arith.constant 0 : i32
    %c0_i32_0 = arith.constant 0 : i32
    return %c0_i32, %arg1 : i32, i32
  }
  func.func @transform_4(%arg0: i32, %arg1: i32, %arg2: i32) -> (i32, i32) {
    %c0_i32 = arith.constant 0 : i32
    return %arg0, %arg1 : i32, i32
  }
}

</mosaic_0001>

<bundles_post_ra>
// kernel: tpu_custom_call.1
= control target key start
LH: loop header
LB: loop body
LE: loop exit
PB: predicated region body
PF: predicated region fallthrough
CT: control target
= control target key end

     0   :  { %9 = vsyncpa [#allocation4], 0  ;;  %s872_s0 = inlined_call_operand.hbm [shape: bf16[128,128], index: 0, kind: input, shape index: {}]   ;;  %s873_s1 = inlined_call_operand.hbm [shape: bf16[128,128], index: 1, kind: input, shape index: {}]   ;;  %s874_s2 = inlined_call_operand.vmem [shape: f32[1,128], index: 2, kind: input, shape index: {}]   ;;  %s875_s3 = inlined_call_operand.vmem [shape: f32[1,128], index: 3, kind: input, shape index: {}]   ;;  %s876_s4 = inlined_call_operand.hbm [shape: bf16[128,128], index: 4, kind: output, shape index: {}]  }
   0x1   :  { %10 = vsyncpa [#allocation7], 0 }
   0x2   :  { %11 = vsyncpa [#allocation5], 0  ;;  %s773_s15 = smov [#allocation3]   ;;  %s701_s19 = scalar_lea.hbm %s872_s0, 1024 }
   0x3   :  { %s17_s16 = sshll.u32 %s773_s15, 4  ;;  %p702_p0 = scmp.ne.s32.totalorder %s872_s0, %s701_s19  ;;  %s18_s16 = int_to_ptr.vmem [resolvable:$true] %s17_s16 }
   0x4   :  { %p705_p1 = scmp.lt.u32.totalorder %s701_s19, %s872_s0 }
   0x6   :  { %p707_p2 = pnand %p705_p1, %p702_p0 }
   0x8   :  { %710 = shalt.err (!%p707_p2)
}
   0x9   :  { %s711_s24 = scalar_lea.vmem %s18_s16, 1024  ;;  %p716_p4 = scmp.lt.s32.totalorder %s18_s16, %s18_s16 }
   0xa   :  { %p712_p3 = scmp.ne.s32.totalorder %s18_s16, %s711_s24  ;;  %p717_p5 = scmp.lt.s32.totalorder %s711_s24, %s711_s24 }
   0xc   :  { %p718_p6 = por %p717_p5, %p716_p4 }
   0xe   :  { %p719_p7 = pnand %p718_p6, %p712_p3 }
  0x10   :  { %722 = shalt.err (!%p719_p7)
}
  0x11   :  { %s774_s25 = smov 64   ;;  %s775_s26 = smov 4  }
  0x12   :  { %23 = dma.hbm_to_vmem [thread:$0]  %s872_s0, 1024, %s18_s16, [#allocation4], %s774_s25, %s774_s25, %s775_s26  }
  0x13   :  { %s776_s29 = smov [#allocation6]   ;;  %s723_s7 = scalar_lea.hbm %s873_s1, 1024 }
  0x14   :  { %s29_s30 = sshll.u32 %s776_s29, 4  ;;  %p724_p8 = scmp.ne.s32.totalorder %s873_s1, %s723_s7  ;;  %s30_s30 = int_to_ptr.vmem [resolvable:$true] %s29_s30 }
  0x15   :  { %p727_p9 = scmp.lt.u32.totalorder %s723_s7, %s873_s1 }
  0x17   :  { %p729_p10 = pnand %p727_p9, %p724_p8 }
  0x19   :  { %732 = shalt.err (!%p729_p10)
}
  0x1a   :  { %s733_s12 = scalar_lea.vmem %s30_s30, 1024  ;;  %p738_p12 = scmp.lt.s32.totalorder %s30_s30, %s30_s30 }
  0x1b   :  { %p734_p11 = scmp.ne.s32.totalorder %s30_s30, %s733_s12  ;;  %p739_p13 = scmp.lt.s32.totalorder %s733_s12, %s733_s12 }
  0x1d   :  { %p740_p0 = por %p739_p13, %p738_p12 }
  0x1f   :  { %p741_p1 = pnand %p740_p0, %p734_p11 }
  0x21   :  { %744 = shalt.err (!%p741_p1)
}
  0x22   :  { %35 = dma.hbm_to_vmem [thread:$0]  %s873_s1, 1024, %s30_s30, [#allocation7], %s774_s25, %s774_s25, %s775_s26  }
  0x23   :  { %767 = dma.done.wait [#allocation4], 1024  }
  0x24   :  { %768 = vsyncadd [#allocation4], 4294966272 }
  0x25   :  { %769 = dma.done.wait [#allocation7], 1024  }
  0x26   :  { %770 = vsyncadd [#allocation7], 4294966272  ;;  %v685_v0 = vld [vmem:[#allocation6] sm:$0xff]   ;;  %v686_v1 = vld [vmem:[#allocation6 + $0x8] sm:$0xff]  }
  0x27   :  { %632 = vmatprep.subr.bf16.mxu0 %v685_v0  ;;  %664 = vmatprep.subr.bf16.mxu1 %v685_v0  ;;  %v687_v2 = vld [vmem:[#allocation6 + $0x10] sm:$0xff]   ;;  %v688_v3 = vld [vmem:[#allocation6 + $0x18] sm:$0xff]   ;;  %v693_v4 = vld [vmem:[#allocation3] sm:$0xff]  }
  0x28   :  { %633 = vmatpush3.bf16.msra.mxu0 %v685_v0  ;;  %672 = vmatpush3.bf16.msra.mxu1 %v685_v0  ;;  %v694_v5 = vld [vmem:[#allocation3 + $0x20] sm:$0xff]   ;;  %v690_v7 = vld [vmem:[#allocation6 + $0x28] sm:$0xff]   ;;  %v691_v8 = vld [vmem:[#allocation6 + $0x30] sm:$0xff]  }
  0x29   :  { %634 = vmatprep.subr.bf16.mxu0 %v686_v1  ;;  %665 = vmatprep.subr.bf16.mxu1 %v686_v1  ;;  %v689_v6 = vld [vmem:[#allocation6 + $0x20] sm:$0xff]   ;;  %v692_v9 = vld [vmem:[#allocation6 + $0x38] sm:$0xff]   ;;  %v695_v10 = vld [vmem:[#allocation3 + $0x8] sm:$0xff]  }
  0x2a   :  { %648 = vmatprep.mubr.bf16.mxu0 %v693_v4  ;;  %656 = vmatprep.mubr.bf16.mxu1 %v694_v5  ;;  %v696_v11 = vld [vmem:[#allocation3 + $0x28] sm:$0xff]   ;;  %v697_v12 = vld [vmem:[#allocation3 + $0x10] sm:$0xff]   ;;  %v699_v14 = vld [vmem:[#allocation3 + $0x18] sm:$0xff]  }
  0x2b   :  { %v698_v13 = vld [vmem:[#allocation3 + $0x30] sm:$0xff]   ;;  %v700_v15 = vld [vmem:[#allocation3 + $0x38] sm:$0xff]   ;;  %v535_v16 = vld [vmem:[%s874_s2] ss:$0 sm:$0xff]  ;;  %s777_s2 = smov [#allocation8]  }
  0x2c   :  { %635 = vmatpush3.bf16.msra.mxu0 %v686_v1  ;;  %673 = vmatpush3.bf16.msra.mxu1 %v686_v1  ;;  %v839_v18 = vld [vmem:[%s875_s3] ss:$0 sm:$0xff]  ;;  %s506_s3 = sshll.u32 %s777_s2, 4  ;;  %s507_s3 = int_to_ptr.vmem [resolvable:$true] %s506_s3 }
  0x2d   :  { %636 = vmatprep.subr.bf16.mxu0 %v687_v2  ;;  %666 = vmatprep.subr.bf16.mxu1 %v687_v2  ;;  %s745_s17 = scalar_lea.vmem %s507_s3, 1024  ;;  %p750_p3 = scmp.lt.s32.totalorder %s507_s3, %s507_s3 }
  0x2e   :  { %p746_p2 = scmp.ne.s32.totalorder %s507_s3, %s745_s17  ;;  %p751_p4 = scmp.lt.s32.totalorder %s745_s17, %s745_s17 }
  0x30   :  { %637 = vmatpush3.bf16.msra.mxu0 %v687_v2  ;;  %674 = vmatpush3.bf16.msra.mxu1 %v687_v2  ;;  %p752_p5 = por %p751_p4, %p750_p3 }
  0x31   :  { %638 = vmatprep.subr.bf16.mxu0 %v688_v3  ;;  %667 = vmatprep.subr.bf16.mxu1 %v688_v3 }
  0x32   :  { %p753_p6 = pnand %p752_p5, %p746_p2 }
  0x34   :  { %639 = vmatpush3.bf16.msra.mxu0 %v688_v3  ;;  %675 = vmatpush3.bf16.msra.mxu1 %v688_v3 }
  0x35   :  { %640 = vmatprep.subr.bf16.mxu0 %v689_v6  ;;  %668 = vmatprep.subr.bf16.mxu1 %v689_v6 }
  0x38   :  { %641 = vmatpush3.bf16.msra.mxu0 %v689_v6  ;;  %676 = vmatpush3.bf16.msra.mxu1 %v689_v6 }
  0x39   :  { %642 = vmatprep.subr.bf16.mxu0 %v690_v7  ;;  %669 = vmatprep.subr.bf16.mxu1 %v690_v7 }
  0x3c   :  { %643 = vmatpush3.bf16.msra.mxu0 %v690_v7  ;;  %677 = vmatpush3.bf16.msra.mxu1 %v690_v7 }
  0x3d   :  { %644 = vmatprep.subr.bf16.mxu0 %v691_v8  ;;  %670 = vmatprep.subr.bf16.mxu1 %v691_v8 }
  0x40   :  { %645 = vmatpush3.bf16.msra.mxu0 %v691_v8  ;;  %678 = vmatpush3.bf16.msra.mxu1 %v691_v8 }
  0x41   :  { %646 = vmatprep.subr.bf16.mxu0 %v692_v9  ;;  %671 = vmatprep.subr.bf16.mxu1 %v692_v9 }
  0x44   :  { %647 = vmatpush3.bf16.msra.mxu0 %v692_v9  ;;  %679 = vmatpush3.bf16.msra.mxu1 %v692_v9 }
  0x47   :  { %649 = vmatmul.mubr.bf16.vlgmr.msra.gmra.mrb[0].mxu0 %v695_v10  ;;  %657 = vmatmul.mubr.bf16.vlgmr.msra.gmra.mrb[0].mxu1 %v696_v11 }
  0x48   :  { %652 = vmatprep.mubr.bf16.mxu0 %v697_v12  ;;  %660 = vmatprep.mubr.bf16.mxu1 %v698_v13 }
  0x4f   :  { %653 = vmatmul.mubr.bf16.gmra.mrb[4].mxu0 %v699_v14  ;;  %661 = vmatmul.mubr.bf16.gmra.mrb[4].mxu1 %v700_v15 }
 0x11a   :  { %v650_v17 = vpop.f32.mrb[0].mxu0  ;;  %v658_v19 = vpop.f32.mrb[0].mxu1 }
 0x11b   :  { %v368_v20 = vmul.f32 %v650_v17, %v535_v16  ;;  %v376_v21 = vmul.f32 %v658_v19, %v535_v16  ;;  %v245_v22 = vpop.f32.mrb[1].mxu0  ;;  %v277_v23 = vpop.f32.mrb[1].mxu1 }
 0x11c   :  { %v366_v24 = vmul.f32 %v535_v16, %v245_v22  ;;  %v374_v25 = vmul.f32 %v535_v16, %v277_v23  ;;  %v651_v26 = vpop.f32.mrb[2].mxu0  ;;  %v659_v27 = vpop.f32.mrb[2].mxu1 }
 0x11d   :  { %v391_v28 = vadd.f32 %v839_v18, %v368_v20  ;;  %v399_v29 = vadd.f32 %v839_v18, %v376_v21  ;;  %v369_v30 = vmul.f32 %v651_v26, %v535_v16  ;;  %v377_v31 = vmul.f32 %v659_v27, %v535_v16  ;;  %v248_v32 = vpop.f32.mrb[3].mxu0  ;;  %v280_v33 = vpop.f32.mrb[3].mxu1 }
 0x11e   :  { %v389_v34 = vadd.f32 %v839_v18, %v366_v24  ;;  %v397_v35 = vadd.f32 %v839_v18, %v374_v25  ;;  %v367_v36 = vmul.f32 %v535_v16, %v248_v32  ;;  %v375_v37 = vmul.f32 %v535_v16, %v280_v33 }
 0x11f   :  { %v392_v38 = vadd.f32 %v839_v18, %v369_v30  ;;  %v400_v39 = vadd.f32 %v839_v18, %v377_v31  ;;  %v407_v42 = vmax.f32 %v391_v28, 0.0  ;;  %v415_v43 = vmax.f32 %v399_v29, 0.0 }
 0x120   :  { %v390_v40 = vadd.f32 %v839_v18, %v367_v36  ;;  %v398_v41 = vadd.f32 %v839_v18, %v375_v37  ;;  %v405_v46 = vmax.f32 %v389_v34, 0.0  ;;  %v413_v47 = vmax.f32 %v397_v35, 0.0 }
 0x121   :  { %v408_v44 = vmax.f32 %v392_v38, 0.0  ;;  %v416_v45 = vmax.f32 %v400_v39, 0.0 }
 0x122   :  { %v406_v48 = vmax.f32 %v390_v40, 0.0  ;;  %v414_v49 = vmax.f32 %v398_v41, 0.0  ;;  %v654_v50 = vpop.f32.mrb[4].mxu0  ;;  %v662_v51 = vpop.f32.mrb[4].mxu1 }
 0x123   :  { %v577_v52 = vpack.c.bf16 %v408_v44, %v407_v42  ;;  %v597_v53 = vpack.c.bf16 %v416_v45, %v415_v43  ;;  %v372_v54 = vmul.f32 %v654_v50, %v535_v16  ;;  %v380_v55 = vmul.f32 %v662_v51, %v535_v16  ;;  %v261_v56 = vpop.f32.mrb[5].mxu0  ;;  %v293_v57 = vpop.f32.mrb[5].mxu1 }
 0x124   :  { %v572_v58 = vpack.c.bf16 %v406_v48, %v405_v46  ;;  %v592_v59 = vpack.c.bf16 %v414_v49, %v413_v47  ;;  %v370_v60 = vmul.f32 %v535_v16, %v261_v56  ;;  %v378_v61 = vmul.f32 %v535_v16, %v293_v57  ;;  %v655_v62 = vpop.f32.mrb[6].mxu0  ;;  %v663_v63 = vpop.f32.mrb[6].mxu1 }
 0x125   :  { %609 = vst [vmem:[#allocation8 + $0x8] sm:$0xff] %v577_v52   ;;  %613 = vst [vmem:[#allocation8 + $0x28] sm:$0xff] %v597_v53   ;;  %v395_v0 = vadd.f32 %v839_v18, %v372_v54  ;;  %v403_v1 = vadd.f32 %v839_v18, %v380_v55  ;;  %v373_v2 = vmul.f32 %v655_v62, %v535_v16  ;;  %v264_v4 = vpop.f32.mrb[7].mxu0  ;;  %v296_v5 = vpop.f32.mrb[7].mxu1 }
 0x126   :  { %v381_v3 = vmul.f32 %v663_v63, %v535_v16  ;;  %573 = vst [vmem:[#allocation8] sm:$0xff] %v572_v58   ;;  %612 = vst [vmem:[#allocation8 + $0x20] sm:$0xff] %v592_v59   ;;  %v393_v6 = vadd.f32 %v839_v18, %v370_v60  ;;  %v401_v7 = vadd.f32 %v839_v18, %v378_v61 }
 0x127   :  { %v371_v8 = vmul.f32 %v535_v16, %v264_v4  ;;  %v379_v9 = vmul.f32 %v535_v16, %v296_v5  ;;  %v396_v10 = vadd.f32 %v839_v18, %v373_v2  ;;  %v411_v14 = vmax.f32 %v395_v0, 0.0 }
 0x128   :  { %v404_v11 = vadd.f32 %v839_v18, %v381_v3  ;;  %v419_v15 = vmax.f32 %v403_v1, 0.0  ;;  %v409_v20 = vmax.f32 %v393_v6, 0.0  ;;  %v417_v21 = vmax.f32 %v401_v7, 0.0 }
 0x129   :  { %v394_v12 = vadd.f32 %v839_v18, %v371_v8  ;;  %v402_v13 = vadd.f32 %v839_v18, %v379_v9  ;;  %v412_v17 = vmax.f32 %v396_v10, 0.0 }
 0x12a   :  { %v420_v19 = vmax.f32 %v404_v11, 0.0 }
 0x12b   :  { %v410_v22 = vmax.f32 %v394_v12, 0.0  ;;  %v418_v23 = vmax.f32 %v402_v13, 0.0  ;;  %v587_v24 = vpack.c.bf16 %v412_v17, %v411_v14 }
 0x12c   :  { %v607_v16 = vpack.c.bf16 %v420_v19, %v419_v15 }
 0x12d   :  { %v582_v25 = vpack.c.bf16 %v410_v22, %v409_v20  ;;  %v602_v26 = vpack.c.bf16 %v418_v23, %v417_v21  ;;  %611 = vst [vmem:[#allocation8 + $0x18] sm:$0xff] %v587_v24  }
 0x12e   :  { %615 = vst [vmem:[#allocation8 + $0x38] sm:$0xff] %v607_v16  }
 0x12f   :  { %610 = vst [vmem:[#allocation8 + $0x10] sm:$0xff] %v582_v25   ;;  %614 = vst [vmem:[#allocation8 + $0x30] sm:$0xff] %v602_v26  }
 0x130   :  { %756 = shalt.err (!%p753_p6)
}
 0x131   :  { %s757_s20 = scalar_lea.hbm %s876_s4, 1024 }
 0x132   :  { %p758_p7 = scmp.ne.s32.totalorder %s876_s4, %s757_s20  ;;  %p761_p8 = scmp.lt.u32.totalorder %s757_s20, %s876_s4 }
 0x134   :  { %p763_p9 = pnand %p761_p8, %p758_p7 }
 0x136   :  { %766 = shalt.err (!%p763_p9)
}
 0x137   :  { %512 = dma.vmem_to_hbm [thread:$0]  %s507_s3, 1024, %s876_s4, [#allocation5], %s774_s25, %s774_s25, %s775_s26  }
 0x138   :  { %771 = dma.done.wait [#allocation5], 1024  }
 0x139   :  { %772 = vsyncadd [#allocation5], 4294966272 }
 0x13a   :  { %516 = vsyncpa [#allocation4], 1 }
 0x13b   :  { %517 = vsyncpa [#allocation7], 1 }
 0x13c   :  { %518 = vsyncpa [#allocation5], 1 }

</bundles_post_ra>
